<compile_context>
chip_gen: v6e
topology: v6e:2x2x1
jax: 0.10.0
libtpu: 0.0.40
codegen_flags: <defaults>
</compile_context>

<pallas_src>
import jax
import jax.numpy as jnp
import numpy as np
from jax.experimental import pallas as pl
from jax.experimental.pallas import tpu as pltpu


# ----------------------------------------------------------------------------
# Kernel 1: 3x3 same-conv + bias + ReLU, in-kernel "im2col" via banded matmuls.
#   x_ref : (1, H+2, (W+2)*C)  bf16  zero-padded NHWC input rows (one image)
#   w_ref : (3, (W+2)*C, W*Cout) bf16 banded conv weights (one band per di)
#   b_ref : (1, W*Cout) f32          conv bias tiled over w
#   o_ref : (1, H, W*Cout) bf16      relu(conv(x) + b), NHWC-flat rows
# ----------------------------------------------------------------------------
def _conv_kernel(x_ref, w_ref, b_ref, o_ref):
    h_out = o_ref.shape[1]
    acc = jnp.zeros((h_out, o_ref.shape[2]), jnp.float32)
    for di in range(3):  # static unroll: 3 banded matmuls, f32 accumulation
        acc = acc + jnp.dot(x_ref[0, di:di + h_out, :], w_ref[di],
                            preferred_element_type=jnp.float32)
    o_ref[0] = jnp.maximum(acc + b_ref[...], 0.0).astype(o_ref.dtype)


def conv3x3_relu(xp_rows, w_band, b_row):
    """xp_rows: (B, H+2, (W+2)*C) bf16; returns (B, H, W*Cout) bf16."""
    B, hp2, in_lanes = xp_rows.shape
    h_out = hp2 - 2
    out_lanes = w_band.shape[2]
    return pl.pallas_call(
        _conv_kernel,
        out_shape=jax.ShapeDtypeStruct((B, h_out, out_lanes), jnp.bfloat16),
        grid_spec=pltpu.PrefetchScalarGridSpec(
            num_scalar_prefetch=0,
            grid=(B,),
            in_specs=[
                pl.BlockSpec((1, hp2, in_lanes), lambda b: (b, 0, 0)),
                pl.BlockSpec(w_band.shape, lambda b: (0, 0, 0)),
                pl.BlockSpec(b_row.shape, lambda b: (0, 0)),
            ],
            out_specs=pl.BlockSpec((1, h_out, out_lanes), lambda b: (b, 0, 0)),
        ),
        compiler_params=pltpu.CompilerParams(
            dimension_semantics=("parallel",)),
    )(xp_rows, w_band, b_row)


# ----------------------------------------------------------------------------
# Kernel 2: fused head (split w1, no concat), value + deterministic action +
# action log-prob. MXU operands bf16, accumulation + elementwise in f32.
# ----------------------------------------------------------------------------
def _head_kernel(conv_ref, pw_ref, pos_ref, w1c_ref, w1p_ref, w1q_ref, b1_ref,
                 wv_ref, bv_ref, wd_ref, bd_ref,
                 value_ref, action_ref, logp_ref):
    f32 = jnp.float32
    h = jnp.dot(conv_ref[...], w1c_ref[...], preferred_element_type=f32)
    h = h + jnp.dot(pw_ref[...].astype(jnp.bfloat16), w1p_ref[...],
                    preferred_element_type=f32)
    h = h + jnp.dot(pos_ref[...].astype(jnp.bfloat16), w1q_ref[...],
                    preferred_element_type=f32)
    h = jnp.maximum(h + b1_ref[...], 0.0)
    hb = h.astype(jnp.bfloat16)

    value_ref[...] = (jnp.dot(hb, wv_ref[...], preferred_element_type=f32)
                      + bv_ref[...])

    # Logits are padded to 128 lanes; padded bias is -1e30 so exp() is exactly
    # 0 and the argmax / logsumexp are unaffected.
    logits = jnp.dot(hb, wd_ref[...], preferred_element_type=f32) + bd_ref[...]
    m = jnp.max(logits, axis=-1, keepdims=True)
    logp_ref[...] = -jnp.log(
        jnp.sum(jnp.exp(logits - m), axis=-1, keepdims=True))

    n_pad = logits.shape[-1]
    idx = jax.lax.broadcasted_iota(jnp.int32, logits.shape, 1)
    action_ref[...] = jnp.min(jnp.where(logits == m, idx, n_pad),
                              axis=-1, keepdims=True)


def policy_head(conv_flat, power, position, w1c, w1p, w1q, b1, wv, bv, wd, bd):
    B = conv_flat.shape[0]

    def full(a):
        nd = a.ndim
        return pl.BlockSpec(a.shape, lambda: (0,) * nd)

    args = (conv_flat, power, position, w1c, w1p, w1q, b1, wv, bv, wd, bd)
    return pl.pallas_call(
        _head_kernel,
        out_shape=(
            jax.ShapeDtypeStruct((B, 1), jnp.float32),   # value
            jax.ShapeDtypeStruct((B, 1), jnp.int32),     # action (mode)
            jax.ShapeDtypeStruct((B, 1), jnp.float32),   # action_log_probs
        ),
        grid_spec=pltpu.PrefetchScalarGridSpec(
            num_scalar_prefetch=0,
            grid=(),
            in_specs=[full(a) for a in args],
            out_specs=(
                pl.BlockSpec((B, 1), lambda: (0, 0)),
                pl.BlockSpec((B, 1), lambda: (0, 0)),
                pl.BlockSpec((B, 1), lambda: (0, 0)),
            ),
        ),
    )(*args)


# ----------------------------------------------------------------------------
# Parameter init (canonical torch layout) + one-time prep for the kernels.
# ----------------------------------------------------------------------------
def init_params(key, c_in, c_out, h, w, n_power, n_pos, hidden, n_actions):
    ks = jax.random.split(key, 8)
    s = 0.1
    return dict(
        conv_w=s * jax.random.normal(ks[0], (c_out, c_in, 3, 3), jnp.float32),
        conv_b=s * jax.random.normal(ks[1], (c_out,), jnp.float32),
        w1=s * jax.random.normal(
            ks[2], (c_out * h * w + n_power + n_pos, hidden), jnp.float32),
        b1=s * jax.random.normal(ks[3], (hidden,), jnp.float32),
        wv=s * jax.random.normal(ks[4], (hidden, 1), jnp.float32),
        bv=s * jax.random.normal(ks[5], (1,), jnp.float32),
        wd=s * jax.random.normal(ks[6], (hidden, n_actions), jnp.float32),
        bd=s * jax.random.normal(ks[7], (n_actions,), jnp.float32),
    )


def prepare_params(params, *, img_hw, n_power, n_pos):
    """One-time weight repacking: banded conv weights, permuted/split w1,
    padded dist head. Done once at init (not per step)."""
    H, W = img_hw
    conv_w = np.asarray(params["conv_w"], np.float32)      # (Cout, C, 3, 3)
    c_out, c_in = conv_w.shape[:2]

    # Banded conv weights: out[h, w*Cout+co] = sum_di row_di(h) @ w_band[di].
    w_band = np.zeros((3, (W + 2) * c_in, W * c_out), np.float32)
    for di in range(3):
        for dj in range(3):
            blk = conv_w[:, :, di, dj].T                   # (C, Cout)
            for w in range(W):
                r0 = (w + dj) * c_in
                c0 = w * c_out
                w_band[di, r0:r0 + c_in, c0:c0 + c_out] = blk
    conv_b_row = np.tile(np.asarray(params["conv_b"], np.float32),
                         W).reshape(1, W * c_out)

    # Split w1 and permute the conv rows once: (c, h, w) -> (h, w, c) so it
    # consumes the kernel's NHWC-flat conv features (kills transpose + concat).
    n_conv = c_out * H * W
    w1 = np.asarray(params["w1"], np.float32)
    hidden = w1.shape[1]
    w1_conv = (w1[:n_conv].reshape(c_out, H, W, hidden)
               .transpose(1, 2, 0, 3).reshape(n_conv, hidden))
    w1_power = w1[n_conv:n_conv + n_power]
    w1_pos = w1[n_conv + n_power:n_conv + n_power + n_pos]

    # Pad the action dim to a full lane (zero weight cols, -1e30 bias).
    wd = np.asarray(params["wd"], np.float32)
    bd = np.asarray(params["bd"], np.float32)
    n_act = wd.shape[1]
    a_pad = max(128, ((n_act + 127) // 128) * 128)
    wd_pad = np.zeros((hidden, a_pad), np.float32)
    wd_pad[:, :n_act] = wd
    bd_pad = np.full((1, a_pad), -1e30, np.float32)
    bd_pad[0, :n_act] = bd

    return dict(
        w_band=jnp.asarray(w_band, jnp.bfloat16),
        conv_b_row=jnp.asarray(conv_b_row, jnp.float32),
        w1_conv=jnp.asarray(w1_conv, jnp.bfloat16),
        w1_power=jnp.asarray(w1_power, jnp.bfloat16),
        w1_pos=jnp.asarray(w1_pos, jnp.bfloat16),
        b1=jnp.asarray(params["b1"], jnp.float32).reshape(1, hidden),
        wv=jnp.asarray(params["wv"], jnp.bfloat16),
        bv=jnp.asarray(params["bv"], jnp.float32).reshape(1, 1),
        wd_pad=jnp.asarray(wd_pad, jnp.bfloat16),
        bd_pad=jnp.asarray(bd_pad, jnp.float32),
    )


# ----------------------------------------------------------------------------
# step() and a pure-JAX reference (mirrors the PyTorch NCHW-flatten + concat
# path with the original weight layout, bf16 MXU operands / f32 accumulation).
# ----------------------------------------------------------------------------
@jax.jit
def policy_step(p, inputs, power, position, rnn_hxs):
    """Policy.step(inputs, power, position, rnn_hxs, deterministic=True)."""
    B, C, H, W = inputs.shape
    # Tiny (4 KB) NCHW->NHWC relayout + zero pad of the *input* only; all
    # activation-side transposes/concats were removed via weight prep.
    x = jnp.transpose(inputs, (0, 2, 3, 1)).astype(jnp.bfloat16)
    xp = jnp.pad(x, ((0, 0), (1, 1), (1, 1), (0, 0)))
    xp_rows = xp.reshape(B, H + 2, (W + 2) * C)            # free (row-major)

    conv = conv3x3_relu(xp_rows, p["w_band"], p["conv_b_row"])
    conv_flat = conv.reshape(B, -1)                        # free (row-major)

    value, action, logp = policy_head(
        conv_flat, power, position,
        p["w1_conv"], p["w1_power"], p["w1_pos"], p["b1"],
        p["wv"], p["bv"], p["wd_pad"], p["bd_pad"])
    # Non-recurrent base: rnn_hxs passes through unchanged.
    return value, action, logp, rnn_hxs


def policy_step_ref(params, inputs, power, position, rnn_hxs):
    B, C, H, W = inputs.shape
    c_out = params["conv_w"].shape[0]
    bf = lambda t: t.astype(jnp.bfloat16)
    # Reference conv via im2col (reference-only XLA code).
    xp = jnp.pad(inputs, ((0, 0), (0, 0), (1, 1), (1, 1)))
    cols = [xp[:, :, i:i + H, j:j + W] for i in range(3) for j in range(3)]
    patches = (jnp.stack(cols, axis=2)                     # (B, C, 9, H, W)
               .transpose(0, 3, 4, 1, 2).reshape(B * H * W, C * 9))
    wc = params["conv_w"].reshape(c_out, C * 9).T
    conv = jnp.maximum(
        jnp.dot(bf(patches), bf(wc), preferred_element_type=jnp.float32)
        + params["conv_b"][None, :], 0.0)
    conv_nchw = conv.reshape(B, H, W, c_out).transpose(0, 3, 1, 2).reshape(B, -1)
    feat = jnp.concatenate([conv_nchw, power, position], axis=1)
    h = jnp.maximum(
        jnp.dot(bf(feat), bf(params["w1"]), preferred_element_type=jnp.float32)
        + params["b1"], 0.0)
    value = (jnp.dot(bf(h), bf(params["wv"]),
                     preferred_element_type=jnp.float32) + params["bv"])
    logits = (jnp.dot(bf(h), bf(params["wd"]),
                      preferred_element_type=jnp.float32) + params["bd"])
    action = jnp.argmax(logits, axis=-1, keepdims=True).astype(jnp.int32)
    logp = (jnp.max(logits, axis=-1, keepdims=True)
            - jax.scipy.special.logsumexp(logits, axis=-1, keepdims=True))
    return value, action, logp, rnn_hxs


if __name__ == "__main__":
    B, C, H, W = 2, 4, 16, 16
    N_POWER, N_POS = 6, 2
    HIDDEN, N_ACTIONS = 32, 6
    C_OUT = 8

    key = jax.random.PRNGKey(0)
    k_p, k_x, k_pw, k_pos = jax.random.split(key, 4)
    params = init_params(k_p, C, C_OUT, H, W, N_POWER, N_POS, HIDDEN,
                         N_ACTIONS)
    prepared = prepare_params(params, img_hw=(H, W), n_power=N_POWER,
                              n_pos=N_POS)

    inputs = jax.random.normal(k_x, (B, C, H, W), jnp.float32)
    power = jax.random.normal(k_pw, (B, N_POWER), jnp.float32)
    position = jax.random.normal(k_pos, (B, N_POS), jnp.float32)
    rnn_hxs = jnp.zeros((B, 1), jnp.float32)

    value, action, logp, rnn_out = policy_step(prepared, inputs, power,
                                               position, rnn_hxs)
    jax.block_until_ready((value, action, logp, rnn_out))

    v_r, a_r, lp_r, _ = policy_step_ref(params, inputs, power, position,
                                        rnn_hxs)
    np.testing.assert_allclose(np.asarray(value), np.asarray(v_r),
                               rtol=5e-3, atol=5e-3)
    np.testing.assert_array_equal(np.asarray(action), np.asarray(a_r))
    np.testing.assert_allclose(np.asarray(logp), np.asarray(lp_r),
                               rtol=5e-3, atol=5e-3)

    # TODO(synk): stochastic dist.sample(), dist_entropy, MultiDiscrete / Box /
    # Bernoulli heads and the recurrent base are not implemented; only the
    # deterministic Discrete step() is covered.
    print("KERNEL_OK")
</pallas_src>

<mosaic_0001>
module attributes {stable_mosaic.version = 11 : i64} {
  func.func @_conv_kernel(%arg0: i32, %arg1: memref<1x18x72xbf16, #tpu.memory_space<vmem>>, %arg2: memref<3x72x128xbf16, #tpu.memory_space<vmem>>, %arg3: memref<1x128xf32, #tpu.memory_space<vmem>>, %arg4: memref<1x16x128xbf16, #tpu.memory_space<vmem>>) attributes {dimension_semantics = [#tpu.dimension_semantics<parallel>], iteration_bounds = array<i64: 2>, scalar_prefetch = 0 : i64, scratch_operands = 0 : i64, tpu.core_type = #tpu.core_type<tc>, window_params = [{transform_indices = @transform_0, window_bounds = array<i64: 1, 18, 72>}, {pipeline_mode = #tpu.pipeline_mode<synchronous>, transform_indices = @transform_1, window_bounds = array<i64: 3, 72, 128>}, {pipeline_mode = #tpu.pipeline_mode<synchronous>, transform_indices = @transform_2, window_bounds = array<i64: 1, 128>}, {transform_indices = @transform_3, window_bounds = array<i64: 1, 16, 128>}]} {
    %cst = arith.constant 0.000000e+00 : f32
    %0 = vector.broadcast %cst : f32 to vector<16x128xf32>
    %c0 = arith.constant 0 : index
    %c0_0 = arith.constant 0 : index
    %c0_1 = arith.constant 0 : index
    %1 = vector.load %arg1[%c0, %c0_0, %c0_1] : memref<1x18x72xbf16, #tpu.memory_space<vmem>>, vector<1x16x72xbf16>
    %2 = vector.shape_cast %1 : vector<1x16x72xbf16> to vector<16x72xbf16>
    %c0_2 = arith.constant 0 : index
    %c0_3 = arith.constant 0 : index
    %c0_4 = arith.constant 0 : index
    %3 = vector.load %arg2[%c0_2, %c0_3, %c0_4] : memref<3x72x128xbf16, #tpu.memory_space<vmem>>, vector<1x72x128xbf16>
    %4 = vector.shape_cast %3 : vector<1x72x128xbf16> to vector<72x128xbf16>
    %cst_5 = arith.constant dense<0.000000e+00> : vector<16x128xf32>
    %5 = tpu.matmul %2, %4, %cst_5 {dimension_numbers = #tpu.dot_dimension_numbers<[1], [0], [0], [1], [0, 0, 1, 1], [], []>} : vector<16x72xbf16>, vector<72x128xbf16>, vector<16x128xf32> -> vector<16x128xf32>
    %6 = arith.addf %0, %5 : vector<16x128xf32>
    %c0_6 = arith.constant 0 : index
    %c1 = arith.constant 1 : index
    %c0_7 = arith.constant 0 : index
    %7 = vector.load %arg1[%c0_6, %c1, %c0_7] : memref<1x18x72xbf16, #tpu.memory_space<vmem>>, vector<1x16x72xbf16>
    %8 = vector.shape_cast %7 : vector<1x16x72xbf16> to vector<16x72xbf16>
    %c1_8 = arith.constant 1 : index
    %c0_9 = arith.constant 0 : index
    %c0_10 = arith.constant 0 : index
    %9 = vector.load %arg2[%c1_8, %c0_9, %c0_10] : memref<3x72x128xbf16, #tpu.memory_space<vmem>>, vector<1x72x128xbf16>
    %10 = vector.shape_cast %9 : vector<1x72x128xbf16> to vector<72x128xbf16>
    %cst_11 = arith.constant dense<0.000000e+00> : vector<16x128xf32>
    %11 = tpu.matmul %8, %10, %cst_11 {dimension_numbers = #tpu.dot_dimension_numbers<[1], [0], [0], [1], [0, 0, 1, 1], [], []>} : vector<16x72xbf16>, vector<72x128xbf16>, vector<16x128xf32> -> vector<16x128xf32>
    %12 = arith.addf %6, %11 : vector<16x128xf32>
    %c0_12 = arith.constant 0 : index
    %c2 = arith.constant 2 : index
    %c0_13 = arith.constant 0 : index
    %13 = vector.load %arg1[%c0_12, %c2, %c0_13] : memref<1x18x72xbf16, #tpu.memory_space<vmem>>, vector<1x16x72xbf16>
    %14 = vector.shape_cast %13 : vector<1x16x72xbf16> to vector<16x72xbf16>
    %c2_14 = arith.constant 2 : index
    %c0_15 = arith.constant 0 : index
    %c0_16 = arith.constant 0 : index
    %15 = vector.load %arg2[%c2_14, %c0_15, %c0_16] : memref<3x72x128xbf16, #tpu.memory_space<vmem>>, vector<1x72x128xbf16>
    %16 = vector.shape_cast %15 : vector<1x72x128xbf16> to vector<72x128xbf16>
    %cst_17 = arith.constant dense<0.000000e+00> : vector<16x128xf32>
    %17 = tpu.matmul %14, %16, %cst_17 {dimension_numbers = #tpu.dot_dimension_numbers<[1], [0], [0], [1], [0, 0, 1, 1], [], []>} : vector<16x72xbf16>, vector<72x128xbf16>, vector<16x128xf32> -> vector<16x128xf32>
    %18 = arith.addf %12, %17 : vector<16x128xf32>
    %c0_18 = arith.constant 0 : index
    %c0_19 = arith.constant 0 : index
    %19 = vector.load %arg3[%c0_18, %c0_19] : memref<1x128xf32, #tpu.memory_space<vmem>>, vector<1x128xf32>
    %20 = vector.broadcast %19 : vector<1x128xf32> to vector<16x128xf32>
    %21 = arith.addf %18, %20 : vector<16x128xf32>
    %cst_20 = arith.constant 0.000000e+00 : f32
    %22 = vector.broadcast %cst_20 : f32 to vector<16x128xf32>
    %23 = arith.maximumf %21, %22 : vector<16x128xf32>
    %24 = arith.truncf %23 : vector<16x128xf32> to vector<16x128xbf16>
    %c0_21 = arith.constant 0 : index
    %c0_22 = arith.constant 0 : index
    %c0_23 = arith.constant 0 : index
    %25 = vector.load %arg4[%c0_21, %c0_22, %c0_23] : memref<1x16x128xbf16, #tpu.memory_space<vmem>>, vector<1x16x128xbf16>
    %26 = vector.shape_cast %25 : vector<1x16x128xbf16> to vector<16x128xbf16>
    %27 = vector.shape_cast %24 : vector<16x128xbf16> to vector<1x16x128xbf16>
    tpu.vector_store %arg4[%c0_21, %c0_22, %c0_23], %27 {strides = array<i32>} : memref<1x16x128xbf16, #tpu.memory_space<vmem>>, vector<1x16x128xbf16>,
    return
  }
  func.func @transform_0(%arg0: i32) -> (i32, i32, i32) {
    %c0_i32 = arith.constant 0 : i32
    %c0_i32_0 = arith.constant 0 : i32
    %c0_i32_1 = arith.constant 0 : i32
    return %arg0, %c0_i32, %c0_i32_0 : i32, i32, i32
  }
  func.func @transform_1(%arg0: i32) -> (i32, i32, i32) {
    %c0_i32 = arith.constant 0 : i32
    %c0_i32_0 = arith.constant 0 : i32
    %c0_i32_1 = arith.constant 0 : i32
    %c0_i32_2 = arith.constant 0 : i32
    return %c0_i32, %c0_i32_0, %c0_i32_1 : i32, i32, i32
  }
  func.func @transform_2(%arg0: i32) -> (i32, i32) {
    %c0_i32 = arith.constant 0 : i32
    %c0_i32_0 = arith.constant 0 : i32
    %c0_i32_1 = arith.constant 0 : i32
    return %c0_i32, %c0_i32_0 : i32, i32
  }
  func.func @transform_3(%arg0: i32) -> (i32, i32, i32) {
    %c0_i32 = arith.constant 0 : i32
    %c0_i32_0 = arith.constant 0 : i32
    %c0_i32_1 = arith.constant 0 : i32
    return %arg0, %c0_i32, %c0_i32_0 : i32, i32, i32
  }
}

module attributes {stable_mosaic.version = 11 : i64} {
  func.func @_head_kernel(%arg0: memref<2x2048xbf16, #tpu.memory_space<vmem>>, %arg1: memref<2x6xf32, #tpu.memory_space<vmem>>, %arg2: memref<2x2xf32, #tpu.memory_space<vmem>>, %arg3: memref<2048x32xbf16, #tpu.memory_space<vmem>>, %arg4: memref<6x32xbf16, #tpu.memory_space<vmem>>, %arg5: memref<2x32xbf16, #tpu.memory_space<vmem>>, %arg6: memref<1x32xf32, #tpu.memory_space<vmem>>, %arg7: memref<32x1xbf16, #tpu.memory_space<vmem>>, %arg8: memref<1x1xf32, #tpu.memory_space<vmem>>, %arg9: memref<32x128xbf16, #tpu.memory_space<vmem>>, %arg10: memref<1x128xf32, #tpu.memory_space<vmem>>, %arg11: memref<2x1xf32, #tpu.memory_space<vmem>>, %arg12: memref<2x1xi32, #tpu.memory_space<vmem>>, %arg13: memref<2x1xf32, #tpu.memory_space<vmem>>) attributes {dimension_semantics = [], scalar_prefetch = 0 : i64, scratch_operands = 0 : i64, tpu.core_type = #tpu.core_type<tc>} {
    %c0 = arith.constant 0 : index
    %c0_0 = arith.constant 0 : index
    %0 = vector.load %arg0[%c0, %c0_0] : memref<2x2048xbf16, #tpu.memory_space<vmem>>, vector<2x2048xbf16>
    %c0_1 = arith.constant 0 : index
    %c0_2 = arith.constant 0 : index
    %1 = vector.load %arg3[%c0_1, %c0_2] : memref<2048x32xbf16, #tpu.memory_space<vmem>>, vector<2048x32xbf16>
    %cst = arith.constant dense<0.000000e+00> : vector<2x32xf32>
    %2 = tpu.matmul %0, %1, %cst {dimension_numbers = #tpu.dot_dimension_numbers<[1], [0], [0], [1], [0, 0, 1, 1], [], []>} : vector<2x2048xbf16>, vector<2048x32xbf16>, vector<2x32xf32> -> vector<2x32xf32>
    %c0_3 = arith.constant 0 : index
    %c0_4 = arith.constant 0 : index
    %3 = vector.load %arg1[%c0_3, %c0_4] : memref<2x6xf32, #tpu.memory_space<vmem>>, vector<2x6xf32>
    %4 = arith.truncf %3 : vector<2x6xf32> to vector<2x6xbf16>
    %c0_5 = arith.constant 0 : index
    %c0_6 = arith.constant 0 : index
    %5 = vector.load %arg4[%c0_5, %c0_6] : memref<6x32xbf16, #tpu.memory_space<vmem>>, vector<6x32xbf16>
    %cst_7 = arith.constant dense<0.000000e+00> : vector<2x32xf32>
    %6 = tpu.matmul %4, %5, %cst_7 {dimension_numbers = #tpu.dot_dimension_numbers<[1], [0], [0], [1], [0, 0, 1, 1], [], []>} : vector<2x6xbf16>, vector<6x32xbf16>, vector<2x32xf32> -> vector<2x32xf32>
    %7 = arith.addf %2, %6 : vector<2x32xf32>
    %c0_8 = arith.constant 0 : index
    %c0_9 = arith.constant 0 : index
    %8 = vector.load %arg2[%c0_8, %c0_9] : memref<2x2xf32, #tpu.memory_space<vmem>>, vector<2x2xf32>
    %9 = arith.truncf %8 : vector<2x2xf32> to vector<2x2xbf16>
    %c0_10 = arith.constant 0 : index
    %c0_11 = arith.constant 0 : index
    %10 = vector.load %arg5[%c0_10, %c0_11] : memref<2x32xbf16, #tpu.memory_space<vmem>>, vector<2x32xbf16>
    %cst_12 = arith.constant dense<0.000000e+00> : vector<2x32xf32>
    %11 = tpu.matmul %9, %10, %cst_12 {dimension_numbers = #tpu.dot_dimension_numbers<[1], [0], [0], [1], [0, 0, 1, 1], [], []>} : vector<2x2xbf16>, vector<2x32xbf16>, vector<2x32xf32> -> vector<2x32xf32>
    %12 = arith.addf %7, %11 : vector<2x32xf32>
    %c0_13 = arith.constant 0 : index
    %c0_14 = arith.constant 0 : index
    %13 = vector.load %arg6[%c0_13, %c0_14] : memref<1x32xf32, #tpu.memory_space<vmem>>, vector<1x32xf32>
    %14 = vector.broadcast %13 : vector<1x32xf32> to vector<2x32xf32>
    %15 = arith.addf %12, %14 : vector<2x32xf32>
    %cst_15 = arith.constant 0.000000e+00 : f32
    %16 = vector.broadcast %cst_15 : f32 to vector<2x32xf32>
    %17 = arith.maximumf %15, %16 : vector<2x32xf32>
    %18 = arith.truncf %17 : vector<2x32xf32> to vector<2x32xbf16>
    %c0_16 = arith.constant 0 : index
    %c0_17 = arith.constant 0 : index
    %19 = vector.load %arg7[%c0_16, %c0_17] : memref<32x1xbf16, #tpu.memory_space<vmem>>, vector<32x1xbf16>
    %cst_18 = arith.constant dense<0.000000e+00> : vector<2x1xf32>
    %20 = tpu.matmul %18, %19, %cst_18 {dimension_numbers = #tpu.dot_dimension_numbers<[1], [0], [0], [1], [0, 0, 1, 1], [], []>} : vector<2x32xbf16>, vector<32x1xbf16>, vector<2x1xf32> -> vector<2x1xf32>
    %c0_19 = arith.constant 0 : index
    %c0_20 = arith.constant 0 : index
    %21 = vector.load %arg8[%c0_19, %c0_20] : memref<1x1xf32, #tpu.memory_space<vmem>>, vector<1x1xf32>
    %22 = vector.broadcast %21 : vector<1x1xf32> to vector<2x1xf32>
    %23 = arith.addf %20, %22 : vector<2x1xf32>
    %c0_21 = arith.constant 0 : index
    %c0_22 = arith.constant 0 : index
    %24 = vector.load %arg11[%c0_21, %c0_22] : memref<2x1xf32, #tpu.memory_space<vmem>>, vector<2x1xf32>
    tpu.vector_store %arg11[%c0_21, %c0_22], %23 {strides = array<i32>} : memref<2x1xf32, #tpu.memory_space<vmem>>, vector<2x1xf32>,
    %c0_23 = arith.constant 0 : index
    %c0_24 = arith.constant 0 : index
    %25 = vector.load %arg9[%c0_23, %c0_24] : memref<32x128xbf16, #tpu.memory_space<vmem>>, vector<32x128xbf16>
    %cst_25 = arith.constant dense<0.000000e+00> : vector<2x128xf32>
    %26 = tpu.matmul %18, %25, %cst_25 {dimension_numbers = #tpu.dot_dimension_numbers<[1], [0], [0], [1], [0, 0, 1, 1], [], []>} : vector<2x32xbf16>, vector<32x128xbf16>, vector<2x128xf32> -> vector<2x128xf32>
    %c0_26 = arith.constant 0 : index
    %c0_27 = arith.constant 0 : index
    %27 = vector.load %arg10[%c0_26, %c0_27] : memref<1x128xf32, #tpu.memory_space<vmem>>, vector<1x128xf32>
    %28 = vector.broadcast %27 : vector<1x128xf32> to vector<2x128xf32>
    %29 = arith.addf %26, %28 : vector<2x128xf32>
    %cst_28 = arith.constant dense<0xFF800000> : vector<2xf32>
    %30 = vector.multi_reduction <maximumf>, %29, %cst_28 [1] : vector<2x128xf32> to vector<2xf32>
    %31 = vector.shape_cast %30 : vector<2xf32> to vector<2x1xf32>
    %32 = vector.broadcast %31 : vector<2x1xf32> to vector<2x128xf32>
    %33 = arith.subf %29, %32 : vector<2x128xf32>
    %34 = math.exp %33 : vector<2x128xf32>
    %cst_29 = arith.constant dense<0.000000e+00> : vector<2xf32>
    %35 = vector.multi_reduction <add>, %34, %cst_29 [1] : vector<2x128xf32> to vector<2xf32>
    %36 = vector.shape_cast %35 : vector<2xf32> to vector<2x1xf32>
    %37 = math.log %36 : vector<2x1xf32>
    %cst_30 = arith.constant 0.000000e+00 : f32
    %38 = vector.broadcast %cst_30 : f32 to vector<2x1xf32>
    %39 = arith.subf %38, %37 : vector<2x1xf32>
    %c0_31 = arith.constant 0 : index
    %c0_32 = arith.constant 0 : index
    %40 = vector.load %arg13[%c0_31, %c0_32] : memref<2x1xf32, #tpu.memory_space<vmem>>, vector<2x1xf32>
    tpu.vector_store %arg13[%c0_31, %c0_32], %39 {strides = array<i32>} : memref<2x1xf32, #tpu.memory_space<vmem>>, vector<2x1xf32>,
    %41 = tpu.iota {dimensions = array<i32: 1>} : vector<2x128xi32>
    %42 = vector.broadcast %31 : vector<2x1xf32> to vector<2x128xf32>
    %43 = arith.cmpf oeq, %29, %42 : vector<2x128xf32>
    %c128_i32 = arith.constant 128 : i32
    %44 = vector.broadcast %c128_i32 : i32 to vector<2x128xi32>
    %45 = arith.select %43, %41, %44 : vector<2x128xi1>, vector<2x128xi32>
    %cst_33 = arith.constant dense<2147483647> : vector<2xi32>
    %46 = vector.multi_reduction <minsi>, %45, %cst_33 [1] : vector<2x128xi32> to vector<2xi32>
    %47 = vector.shape_cast %46 : vector<2xi32> to vector<2x1xi32>
    %c0_34 = arith.constant 0 : index
    %c0_35 = arith.constant 0 : index
    %48 = vector.load %arg12[%c0_34, %c0_35] : memref<2x1xi32, #tpu.memory_space<vmem>>, vector<2x1xi32>
    tpu.vector_store %arg12[%c0_34, %c0_35], %47 {strides = array<i32>} : memref<2x1xi32, #tpu.memory_space<vmem>>, vector<2x1xi32>,
    return
  }
}

</mosaic_0001>

<bundles_post_ra>
// kernel: policy_step.2
= control target key start
LH: loop header
LB: loop body
LE: loop exit
PB: predicated region body
PF: predicated region fallthrough
CT: control target
= control target key end

     0   :  { %s713_s12 = smov 0   ;;  %s815_s0 = inlined_call_operand.vmem [shape: bf16[2,18,72], index: 0, kind: input, shape index: {}]   ;;  %s816_s1 = inlined_call_operand.vmem [shape: bf16[3,72,128], index: 1, kind: input, shape index: {}]   ;;  %s817_s2 = inlined_call_operand.vmem [shape: f32[1,128], index: 2, kind: input, shape index: {}]   ;;  %s818_s3 = inlined_call_operand.vmem [shape: bf16[2,16,128], index: 3, kind: output, shape index: {}]  }
   0x1 LB: > { %s534_s13 = sadd.s32 4294967295, %s689_s12   ;;  %p538_p0 = scmp.ge.s32.totalorder %s689_s12, 1  ;;  %s689_s12 = sphi %s713_s12, %s13_s12  }
   0x2   : > { %p137_p1 = scmp.lt.s32.totalorder %s689_s12, 3 }
   0x4   : > { %p138_p2 = pnand %p538_p0, %p137_p1 }
   0x5   : > { %p161_p3 = scmp.lt.s32.totalorder (!%p138_p2), %s534_s13, 1 }
   0x6   : > { %141 = sbr.rel (%p138_p2) target bundleno = 258 (0x102), region = 32 }
   0xb   : > { %v665_v0 = vld [vmem:[%s816_s1 + $0x44] ss:$0 sps:$4 sm:$0xff]   ;;  %vm246_vm0 = vcmask 1043456   ;;  %v691_v1 = vmov 0.0   ;;  %v666_v2 = vld [vmem:[%s816_s1 + $0x20] ss:$0 sps:$4 sm:$0xff]  }
   0xc   : > { %612 = vmatprep.subr.bf16.mxu0 %v691_v1  ;;  %626 = vmatprep.subr.bf16.mxu1 %v691_v1  ;;  %v248_v3 = vsel %vm246_vm0, %v665_v0, 0  ;;  %v321_v4 = vsel %vm246_vm0, %v666_v2, 0  ;;  %v667_v5 = vld [vmem:[%s816_s1 + $0x3c] sm:$0xff]   ;;  %vm692_vm1 = vmmov 0   ;;  %v669_v7 = vld [vmem:[%s816_s1 + $0x34] sm:$0xff]   ;;  %s820_s13 = smov (!%p161_p3, %s534_s13), 1 }
   0xd   : > { %613 = vmatpush3.bf16.msra.mxu0 %v248_v3  ;;  %627 = vmatpush3.bf16.msra.mxu1 %v321_v4  ;;  %v668_v6 = vld [vmem:[%s816_s1 + $0x18] sm:$0xff]   ;;  %v670_v8 = vld [vmem:[%s816_s1 + $0x10] sm:$0xff]   ;;  %s654_s26 = smul.u32 12, %s820_s13  ;;  %v672_v10 = vld [vmem:[%s816_s1 + $0x8] sm:$0xff]   ;;  %vm202_vm2 = vsmask.f32 7424 }
   0xe   : > { %614 = vmatprep.subr.bf16.mxu0 %v691_v1  ;;  %628 = vmatprep.subr.bf16.mxu1 %v691_v1  ;;  %v671_v9 = vld [vmem:[%s816_s1 + $0x2c] sm:$0xff]   ;;  %v673_v15 = vld [vmem:[%s816_s1 + $0x24] sm:$0xff]   ;;  %vm242_vm3 = vcmask 588800   ;;  %v679_v27 = vld [vmem:[%s816_s1 + $0x58] sm:$0xff]   ;;  %vm378_vm4 = vcmask 1046528   ;;  %s586_s25 = sshll.u32 %s820_s13, 3 }
   0xf   : > { %622 = vmatprep.mubr.msk.bf16.mxu0 %vm692_vm1, %v691_v1  ;;  %636 = vmatprep.mubr.msk.bf16.mxu1 %vm692_vm1, %v691_v1  ;;  %s763_s6 = scalar_lea.vmem %s815_s0, %s654_s26  ;;  %v674_v19 = vld [vmem:[%s816_s1] sm:$0xff]   ;;  %v677_v20 = vld [vmem:[%s816_s1 + $0x68] ss:$0 sps:$4 sm:$0xff]   ;;  %v680_v29 = vld [vmem:[%s816_s1 + $0x50] sm:$0xff]   ;;  %s170_s28 = scalar_lea.vmem %s818_s3, %s586_s25 }
  0x10   : > { %v172_v11 = vld [vmem:[%s763_s6] sm:$0xf]  ;;  %v173_v12 = vld [vmem:[%s763_s6 + $0x4] sm:$0xf]  ;;  %v413_v24 = vsel %vm246_vm0, %v677_v20, 0  ;;  %v681_v31 = vld [vmem:[%s816_s1 + $0x48] sm:$0xff]  }
  0x11   : > { %615 = vmatpush3.bf16.msra.mxu0 %v667_v5  ;;  %629 = vmatpush3.bf16.msra.mxu1 %v668_v6  ;;  %v551_v13 = vcombine.low %v172_v11, %v173_v12  ;;  %v676_v14 = vld [vmem:[%s763_s6 + $0x8] ss:$0 sps:$4 sm:$0x11]   ;;  %v678_v26 = vld [vmem:[%s816_s1 + $0x60] sm:$0xff]  }
  0x12   : > { %616 = vmatprep.subr.bf16.mxu0 %v691_v1  ;;  %630 = vmatprep.subr.bf16.mxu1 %v691_v1  ;;  %v211_v18 = vshll.u32 %v676_v14, 16  ;;  %v364_v28 = vld [vmem:[%s763_s6] sm:$0xe]  ;;  %v380_v33 = vrot.slane %v676_v14, 1  ;;  %v581_v46 = vld [vmem:[%s817_s2] ss:$0 sm:$0xff] }
  0x13   : > { %v204_v16 = vshrl.u32 %v551_v13, 16  ;;  %v206_v17 = vshll.u32 %v551_v13, 16  ;;  %v574_v30 = vcombine.low %v364_v28, %v173_v12 }
  0x14   : > { %v213_v22 = vrot.slane %v211_v18, 1 }
  0x15   : > { %617 = vmatpush3.bf16.msra.mxu0 %v669_v7  ;;  %631 = vmatpush3.bf16.msra.mxu1 %v670_v8  ;;  %v208_v21 = vrot.slane %v206_v17, 1  ;;  %v379_v32 = vrot.slane %v574_v30, 1 }
  0x16   : > { %618 = vmatprep.subr.bf16.mxu0 %v691_v1  ;;  %632 = vmatprep.subr.bf16.mxu1 %v691_v1 }
  0x17   : > { %v209_v23 = vor.u32 %v208_v21, %v204_v16  ;;  %v381_v34 = vsel %vm378_vm4, %v379_v32, %v380_v33 }
  0x19   : > { %619 = vmatpush3.bf16.msra.mxu0 %v671_v9  ;;  %633 = vmatpush3.bf16.msra.mxu1 %v672_v10  ;;  %v214_v25 = vsel %vm202_vm2, %v209_v23, %v213_v22 }
  0x1a   : > { %620 = vmatprep.subr.bf16.mxu0 %v691_v1  ;;  %634 = vmatprep.subr.bf16.mxu1 %v691_v1 }
  0x1d   : > { %621 = vmatpush3.bf16.msra.mxu0 %v673_v15  ;;  %635 = vmatpush3.bf16.msra.mxu1 %v674_v19 }
  0x1e   : > { %640 = vmatprep.subr.bf16.mxu0 %v691_v1 }
  0x20   : > { %623 = vmatmul.mubr.msk.bf16.vlgmr.msra.gmra.mxu0 %vm242_vm3, %v214_v25  ;;  %637 = vmatmul.mubr.msk.bf16.vlgmr.msra.gmra.mxu1 %vm242_vm3, %v551_v13 }
  0x21   : > { %641 = vmatpush3.bf16.msra.mxu0 %v413_v24  ;;  %650 = vmatprep.mubr.msk.bf16.mxu0 %vm692_vm1, %v691_v1 }
  0x22   : > { %642 = vmatprep.subr.bf16.mxu0 %v691_v1 }
  0x25   : > { %643 = vmatpush3.bf16.msra.mxu0 %v678_v26 }
  0x26   : > { %644 = vmatprep.subr.bf16.mxu0 %v691_v1 }
  0x29   : > { %645 = vmatpush3.bf16.msra.mxu0 %v679_v27 }
  0x2a   : > { %646 = vmatprep.subr.bf16.mxu0 %v691_v1 }
  0x2d   : > { %647 = vmatpush3.bf16.msra.mxu0 %v680_v29 }
  0x2e   : > { %648 = vmatprep.subr.bf16.mxu0 %v691_v1 }
  0x31   : > { %649 = vmatpush3.bf16.msra.mxu0 %v681_v31 }
  0x34   : > { %651 = vmatmul.mubr.msk.bf16.vlgmr.msra.gmra.mxu0 %vm242_vm3, %v381_v34 }
  0xe0   : > { %v284_v35 = vpop.f32.mrf.mxu0  ;;  %v357_v36 = vpop.f32.mrf.mxu1 }
  0xe1   : > { %v358_v43 = vadd.f32 %v357_v36, %v284_v35 }
  0xe2   : > { %v624_v37 = vpop.f32.mrf.mxu0  ;;  %v638_v38 = vpop.f32.mrf.mxu1 }
  0xe4   : > { %v287_v39 = vpop.f32.mrf.mxu0  ;;  %v360_v40 = vpop.f32.mrf.mxu1 }
  0xe5   : > { %v361_v48 = vadd.f32 %v360_v40, %v287_v39 }
  0xe6   : > { %v625_v41 = vpop.f32.mrf.mxu0  ;;  %v639_v42 = vpop.f32.mrf.mxu1 }
  0xf4   : > { %v449_v44 = vpop.f32.mrf.mxu0 }
  0xf5   : > { %v456_v45 = vadd.f32 %v449_v44, %v358_v43 }
  0xf6   : > { %v652_v47 = vpop.f32.mrf.mxu0 }
  0xf7   : > { %v465_v50 = vadd.f32 %v581_v46, %v456_v45 }
  0xf8   : > { %v452_v49 = vpop.f32.mrf.mxu0 }
  0xf9   : > { %v457_v51 = vadd.f32 %v452_v49, %v361_v48  ;;  %v467_v54 = vmax.f32 %v465_v50, 0.0 }
  0xfa   : > { %v653_v52 = vpop.f32.mrf.mxu0 }
  0xfb   : > { %v466_v53 = vadd.f32 %v581_v46, %v457_v51 }
  0xfd   : > { %v468_v55 = vmax.f32 %v466_v53, 0.0 }
  0xff   : > { %v592_v56 = vpack.c.bf16 %v468_v55, %v467_v54 }
 0x101   : > { %593 = vst [vmem:[%s170_s28] sm:$0xff] %v592_v56  }
 0x102 PF: > { %s13_s12 = sadd.s32 1, %s689_s12  }
 0x103   : > { %p10_p4 = scmp.ge.s32.totalorder %s13_s12, 4  }
 0x105   :  { %12 = sbr.rel (!%p10_p4) target bundleno = 1 (0x1), region = 64 }

// kernel: policy_step.3
= control target key start
LH: loop header
LB: loop body
LE: loop exit
PB: predicated region body
PF: predicated region fallthrough
CT: control target
= control target key end

     0   :  { %vm309_vm0 = vcmask 1042432   ;;  %v2291_v0 = vmov 0.0   ;;  %vm2292_vm1 = vmmov 0   ;;  %vm305_vm2 = vcmask 48128   ;;  %s2852_s4 = inlined_call_operand.vmem [shape: bf16[6,32], index: 4, kind: input, shape index: {}]   ;;  %s2853_s3 = inlined_call_operand.vmem [shape: bf16[2048,32], index: 3, kind: input, shape index: {}]   ;;  %s2854_s1 = inlined_call_operand.vmem [shape: f32[2,6], index: 1, kind: input, shape index: {}]   ;;  %s2855_s0 = inlined_call_operand.vmem [shape: bf16[2,2048], index: 0, kind: input, shape index: {}]   ;;  %s2856_s5 = inlined_call_operand.vmem [shape: bf16[2,32], index: 5, kind: input, shape index: {}]   ;;  %s2857_s2 = inlined_call_operand.vmem [shape: f32[2,2], index: 2, kind: input, shape index: {}]   ;;  %s2858_s7 = inlined_call_operand.vmem [shape: bf16[32,1], index: 7, kind: input, shape index: {}]   ;;  %s2859_s9 = inlined_call_operand.vmem [shape: bf16[32,128], index: 9, kind: input, shape index: {}]   ;;  %s2860_s8 = inlined_call_operand.<no memory space> [shape: f32[1,1], index: 8, kind: input, shape index: {}]   ;;  %s2861_s6 = inlined_call_operand.vmem [shape: f32[1,32], index: 6, kind: input, shape index: {}]   ;;  %s2862_s10 = inlined_call_operand.vmem [shape: f32[1,128], index: 10, kind: input, shape index: {}]   ;;  %s2863_s11 = inlined_call_operand.vmem [shape: f32[2,1], index: 11, kind: output, shape index: {0}]   ;;  %s2864_s13 = inlined_call_operand.vmem [shape: f32[2,1], index: 13, kind: output, shape index: {2}]   ;;  %s2865_s12 = inlined_call_operand.vmem [shape: s32[2,1], index: 12, kind: output, shape index: {1}]  }
   0x1   :  { %2122 = vmatprep.subr.bf16.mxu0 %v2291_v0  ;;  %v304_v1 = vld [vmem:[%s2852_s4] sm:$0x7]  ;;  %2124 = vmatprep.mubr.msk.bf16.mxu0 %vm2292_vm1, %v2291_v0  ;;  %v2153_v3 = vld [vmem:[%s2853_s3 + $0x78] sm:$0xff]   ;;  %v2157_v9 = vld [vmem:[%s2853_s3 + $0x70] sm:$0xff]   ;;  %v359_v33 = vlaneseq  ;;  %v2293_v38 = vmov 1966171168  }
   0x2   :  { %v311_v2 = vsel %vm309_vm0, %v304_v1, 0  ;;  %v2154_v4 = vld [vmem:[%s2853_s3 + $0x38] sm:$0xff]   ;;  %v302_v5 = vld [vmem:[%s2854_s1] sm:$0x3]  ;;  %1938 = vmatprep.subr.bf16.mxu1 %v2153_v3  ;;  %v2158_v10 = vld [vmem:[%s2853_s3 + $0x30] sm:$0xff]   ;;  %v357_v39 = vunpack.c.l.s4 %v2293_v38  ;;  %vm1564_vm3 = vcmask 1040384  }
   0x3   :  { %2123 = vmatpush3.bf16.msra.mxu0 %v311_v2  ;;  %v303_v6 = vpack.c.bf16 %v302_v5, %v302_v5  ;;  %v2155_v7 = vld [vmem:[%s2853_s3 + $0xf8] sm:$0xff]   ;;  %1939 = vmatpush3.bf16.msra.mxu1 %v2154_v4  ;;  %v2159_v11 = vld [vmem:[%s2853_s3 + $0xf0] sm:$0xff]   ;;  %v2161_v13 = vld [vmem:[%s2853_s3 + $0x68] sm:$0xff]   ;;  %v360_v40 = vshrl.u32 %v359_v33, 7  ;;  %vm1560_vm4 = vcmask 15360   ;;  %vm1642_vm5 = vcmask 261120  }
   0x4   :  { %v2156_v8 = vld [vmem:[%s2853_s3 + $0xb8] sm:$0xff]   ;;  %1960 = vmatprep.subr.bf16.mxu0 %v2155_v7  ;;  %1940 = vmatprep.subr.bf16.mxu1 %v2157_v9  ;;  %v2160_v12 = vld [vmem:[%s2853_s3 + $0xb0] sm:$0xff]   ;;  %v2162_v14 = vld [vmem:[%s2853_s3 + $0x28] sm:$0xff]   ;;  %v358_v43 = vunpack.c.0.s8 %v357_v39  ;;  %vm1686_vm6 = vcmask 1024   ;;  %vm1751_vm7 = vcmask 1041408  }
   0x5   :  { %v2163_v15 = vld [vmem:[%s2853_s3 + $0xe8] sm:$0xff]   ;;  %v2165_v17 = vld [vmem:[%s2853_s3 + $0x60] sm:$0xff]   ;;  %v2169_v21 = vld [vmem:[%s2853_s3 + $0x58] sm:$0xff]  }
   0x6   :  { %2125 = vmatmul.mubr.msk.bf16.vlgmr.msra.gmra.mxu0 %vm305_vm2, %v303_v6  ;;  %v2164_v16 = vld [vmem:[%s2853_s3 + $0xa8] sm:$0xff]   ;;  %v2166_v18 = vld [vmem:[%s2853_s3 + $0x20] sm:$0xff]   ;;  %v2170_v22 = vld [vmem:[%s2853_s3 + $0x18] sm:$0xff]   ;;  %v2476_v45 = vsub.s32 %v358_v43, %v360_v40 }
   0x7   :  { %1961 = vmatpush3.bf16.msra.mxu0 %v2156_v8  ;;  %1941 = vmatpush3.bf16.msra.mxu1 %v2158_v10  ;;  %v2167_v19 = vld [vmem:[%s2853_s3 + $0xe0] sm:$0xff]   ;;  %v2171_v23 = vld [vmem:[%s2853_s3 + $0xd8] sm:$0xff]   ;;  %v2173_v25 = vld [vmem:[%s2853_s3 + $0x50] sm:$0xff]  }
   0x8   :  { %1962 = vmatprep.subr.bf16.mxu0 %v2159_v11  ;;  %1942 = vmatprep.subr.bf16.mxu1 %v2161_v13  ;;  %v2168_v20 = vld [vmem:[%s2853_s3 + $0xa0] sm:$0xff]   ;;  %v2172_v24 = vld [vmem:[%s2853_s3 + $0x98] sm:$0xff]   ;;  %v2174_v26 = vld [vmem:[%s2853_s3 + $0x10] sm:$0xff]  }
   0x9   :  { %v2175_v27 = vld [vmem:[%s2853_s3 + $0xd0] sm:$0xff]   ;;  %v2177_v29 = vld [vmem:[%s2853_s3 + $0x48] sm:$0xff]   ;;  %v2181_v34 = vld [vmem:[%s2853_s3 + $0x40] sm:$0xff]  }
   0xa   :  { %v2176_v28 = vld [vmem:[%s2853_s3 + $0x90] sm:$0xff]   ;;  %v2178_v30 = vld [vmem:[%s2853_s3 + $0x8] sm:$0xff]   ;;  %v2182_v35 = vld [vmem:[%s2853_s3] sm:$0xff]  }
   0xb   :  { %1963 = vmatpush3.bf16.msra.mxu0 %v2160_v12  ;;  %1943 = vmatpush3.bf16.msra.mxu1 %v2162_v14  ;;  %v2179_v31 = vld [vmem:[%s2853_s3 + $0xc8] sm:$0xff]   ;;  %v2183_v36 = vld [vmem:[%s2853_s3 + $0xc0] sm:$0xff]   ;;  %v2187_v44 = vld [vmem:[%s2853_s3 + $0x178] sm:$0xff]  }
   0xc   :  { %1964 = vmatprep.subr.bf16.mxu0 %v2163_v15  ;;  %1944 = vmatprep.subr.bf16.mxu1 %v2165_v17  ;;  %v2180_v32 = vld [vmem:[%s2853_s3 + $0x88] sm:$0xff]   ;;  %v44_v37 = vld [vmem:[%s2855_s0] sm:$0xff]  ;;  %v2189_v46 = vld [vmem:[%s2853_s3 + $0x1f8] sm:$0xff]  }
   0xd   :  { %v2186_v41 = vld [vmem:[%s2853_s3 + $0x80] sm:$0xff]   ;;  %v355_v42 = vcombine.high %v44_v37, %v44_v37  ;;  %v362_v47 = vrot.slane %v44_v37, %v2476_v45  ;;  %v2188_v53 = vld [vmem:[%s2853_s3 + $0x138] sm:$0xff]   ;;  %v2191_v56 = vld [vmem:[%s2853_s3 + $0x170] sm:$0xff]  }
   0xe   :  { %v2190_v58 = vld [vmem:[%s2853_s3 + $0x1b8] sm:$0xff]   ;;  %v2193_v59 = vld [vmem:[%s2853_s3 + $0x1f0] sm:$0xff]   ;;  %v2195_v62 = vld [vmem:[%s2853_s3 + $0x168] sm:$0xff]  }
   0xf   :  { %1965 = vmatpush3.bf16.msra.mxu0 %v2164_v16  ;;  %1945 = vmatpush3.bf16.msra.mxu1 %v2166_v18  ;;  %v2483_v48 = vrot.slane %v355_v42, %v2476_v45  ;;  %v370_v49 = vcombine.high %v362_v47, %v362_v47  ;;  %v378_v50 = vrot.slane %v362_v47, %v2476_v45  ;;  %v2192_v61 = vld [vmem:[%s2853_s3 + $0x130] sm:$0xff]   ;;  %v2197_v1 = vld [vmem:[%s2853_s3 + $0x1e8] sm:$0xff]   ;;  %v2199_v3 = vld [vmem:[%s2853_s3 + $0x160] sm:$0xff]  }
  0x10   :  { %1966 = vmatprep.subr.bf16.mxu0 %v2167_v19  ;;  %1946 = vmatprep.subr.bf16.mxu1 %v2169_v21  ;;  %v2194_v63 = vld [vmem:[%s2853_s3 + $0x1b0] sm:$0xff]   ;;  %v2196_v2 = vld [vmem:[%s2853_s3 + $0x128] sm:$0xff]   ;;  %v2201_v5 = vld [vmem:[%s2853_s3 + $0x1e0] sm:$0xff]  }
  0x11   :  { %v371_v51 = vcombine.high %v2483_v48, %v2483_v48  ;;  %v392_v52 = vrot.slane %v370_v49, %v2476_v45  ;;  %v400_v55 = vcombine.high %v378_v50, %v378_v50  ;;  %v2198_v4 = vld [vmem:[%s2853_s3 + $0x1a8] sm:$0xff]   ;;  %v2200_v6 = vld [vmem:[%s2853_s3 + $0x120] sm:$0xff]   ;;  %v2203_v7 = vld [vmem:[%s2853_s3 + $0x158] sm:$0xff]  }
  0x12   :  { %v2202_v8 = vld [vmem:[%s2853_s3 + $0x1a0] sm:$0xff]   ;;  %v2205_v9 = vld [vmem:[%s2853_s3 + $0x1d8] sm:$0xff]   ;;  %v2544_v11 = vld [vmem:[%s2855_s0 + $0x8] sm:$0xff] }
  0x13   :  { %1967 = vmatpush3.bf16.msra.mxu0 %v2168_v20  ;;  %1947 = vmatpush3.bf16.msra.mxu1 %v2170_v22  ;;  %v399_v54 = vrot.slane %v371_v51, %v2476_v45  ;;  %v402_v57 = vcombine.high %v392_v52, %v392_v52  ;;  %v2204_v10 = vld [vmem:[%s2853_s3 + $0x118] sm:$0xff]   ;;  %v2207_v12 = vld [vmem:[%s2853_s3 + $0x150] sm:$0xff]   ;;  %v2211_v16 = vld [vmem:[%s2853_s3 + $0x148] sm:$0xff]   ;;  %v2566_v18 = vrot.slane %v2544_v11, %v2476_v45 }
  0x14   :  { %1968 = vmatprep.subr.bf16.mxu0 %v2171_v23  ;;  %1948 = vmatprep.subr.bf16.mxu1 %v2173_v25  ;;  %v2206_v13 = vld [vmem:[%s2853_s3 + $0x198] sm:$0xff]   ;;  %v2209_v14 = vld [vmem:[%s2853_s3 + $0x1d0] sm:$0xff]   ;;  %v2213_v19 = vld [vmem:[%s2853_s3 + $0x1c8] sm:$0xff]  }
  0x15   :  { %1269 = vmatprep.mubr.bf16.mxu1 %v392_v52  ;;  %v403_v60 = vcombine.high %v399_v54, %v399_v54  ;;  %1309 = vmatprep.mubr.bf16.mxu0 %v402_v57  ;;  %v2208_v15 = vld [vmem:[%s2853_s3 + $0x110] sm:$0xff]   ;;  %v2212_v20 = vld [vmem:[%s2853_s3 + $0x108] sm:$0xff]   ;;  %v2215_v21 = vld [vmem:[%s2853_s3 + $0x140] sm:$0xff]   ;;  %v419_v23 = vcombine.high %v2566_v18, %v2566_v18 }
  0x16   :  { %v2210_v17 = vld [vmem:[%s2853_s3 + $0x190] sm:$0xff]   ;;  %v2214_v22 = vld [vmem:[%s2853_s3 + $0x188] sm:$0xff]   ;;  %v2216_v25 = vld [vmem:[%s2853_s3 + $0x100] sm:$0xff]  }
  0x17   :  { %1969 = vmatpush3.bf16.msra.mxu0 %v2172_v24  ;;  %1949 = vmatpush3.bf16.msra.mxu1 %v2174_v26  ;;  %v2217_v24 = vld [vmem:[%s2853_s3 + $0x1c0] sm:$0xff]   ;;  %v385_v26 = vrot.slane %v2483_v48, %v2476_v45  ;;  %v2225_v37 = vld [vmem:[%s2853_s3 + $0x2f0] sm:$0xff]   ;;  %v2227_v39 = vld [vmem:[%s2853_s3 + $0x268] sm:$0xff]  }
  0x18   :  { %1970 = vmatprep.subr.bf16.mxu0 %v2175_v27  ;;  %1950 = vmatprep.subr.bf16.mxu1 %v2177_v29  ;;  %v2219_v27 = vld [vmem:[%s2853_s3 + $0x278] sm:$0xff]   ;;  %v441_v29 = vrot.slane %v419_v23, %v2476_v45  ;;  %v2224_v38 = vld [vmem:[%s2853_s3 + $0x230] sm:$0xff]   ;;  %v2228_v42 = vld [vmem:[%s2853_s3 + $0x228] sm:$0xff]  }
  0x19   :  { %v2226_v40 = vld [vmem:[%s2853_s3 + $0x2b0] sm:$0xff]   ;;  %v2231_v43 = vld [vmem:[%s2853_s3 + $0x260] sm:$0xff]   ;;  %v2235_v48 = vld [vmem:[%s2853_s3 + $0x258] sm:$0xff]  }
  0x1a   :  { %v2232_v47 = vld [vmem:[%s2853_s3 + $0x220] sm:$0xff]   ;;  %v2236_v51 = vld [vmem:[%s2853_s3 + $0x218] sm:$0xff]   ;;  %v2239_v52 = vld [vmem:[%s2853_s3 + $0x250] sm:$0xff]  }
  0x1b   :  { %1971 = vmatpush3.bf16.msra.mxu0 %v2176_v28  ;;  %1951 = vmatpush3.bf16.msra.mxu1 %v2178_v30  ;;  %v2218_v28 = vld [vmem:[%s2853_s3 + $0x180] sm:$0xff]   ;;  %v2221_v30 = vld [vmem:[%s2853_s3 + $0x2f8] sm:$0xff]   ;;  %v2243_v57 = vld [vmem:[%s2853_s3 + $0x248] sm:$0xff]  }
  0x1c   :  { %1972 = vmatprep.subr.bf16.mxu0 %v2179_v31  ;;  %1952 = vmatprep.subr.bf16.mxu1 %v2181_v34  ;;  %v2220_v31 = vld [vmem:[%s2853_s3 + $0x238] sm:$0xff]   ;;  %v2223_v34 = vld [vmem:[%s2853_s3 + $0x270] sm:$0xff]   ;;  %v2234_v49 = vld [vmem:[%s2853_s3 + $0x2a0] sm:$0xff]  }
  0x1d   :  { %v2264_v23 = vld [vmem:[%s2853_s3 + $0x320] sm:$0xff]  }
  0x1f   :  { %1973 = vmatpush3.bf16.msra.mxu0 %v2180_v32  ;;  %1953 = vmatpush3.bf16.msra.mxu1 %v2182_v35  ;;  %v401_v32 = vcombine.high %v385_v26, %v385_v26  ;;  %v2222_v35 = vld [vmem:[%s2853_s3 + $0x2b8] sm:$0xff]  }
  0x20   :  { %1974 = vmatprep.subr.bf16.mxu0 %v2183_v36  ;;  %1982 = vmatprep.subr.bf16.mxu1 %v2187_v44  ;;  %v451_v36 = vcombine.high %v441_v29, %v441_v29  ;;  %v2230_v44 = vld [vmem:[%s2853_s3 + $0x2a8] sm:$0xff]  }
  0x22   :  { %1270 = vmatmul.mubr.bf16.vlgmr.msra.gmra.mxu1 %v378_v50  ;;  %v2237_v50 = vld [vmem:[%s2853_s3 + $0x2d8] sm:$0xff]  }
  0x23   :  { %1975 = vmatpush3.bf16.msra.mxu0 %v2186_v41  ;;  %1983 = vmatpush3.bf16.msra.mxu1 %v2188_v53  ;;  %v2229_v41 = vld [vmem:[%s2853_s3 + $0x2e8] sm:$0xff]   ;;  %v404_v53 = vcombine.high %v2544_v11, %v2544_v11  ;;  %v2255_v11 = vld [vmem:[%s2853_s3 + $0x370] sm:$0xff]  }
  0x24   :  { %2004 = vmatprep.subr.bf16.mxu0 %v2189_v46  ;;  %1984 = vmatprep.subr.bf16.mxu1 %v2191_v56  ;;  %v2233_v46 = vld [vmem:[%s2853_s3 + $0x2e0] sm:$0xff]   ;;  %v2240_v56 = vld [vmem:[%s2853_s3 + $0x210] sm:$0xff]  }
  0x25   :  { %1349 = vmatprep.mubr.bf16.mxu1 %v399_v54  ;;  %v2238_v54 = vld [vmem:[%s2853_s3 + $0x298] sm:$0xff]  }
  0x26   :  { %1310 = vmatmul.mubr.bf16.vlgmr.msra.gmra.mxu0 %v400_v55  ;;  %v2241_v55 = vld [vmem:[%s2853_s3 + $0x2d0] sm:$0xff]  }
  0x27   :  { %2005 = vmatpush3.bf16.msra.mxu0 %v2190_v58  ;;  %1389 = vmatprep.mubr.bf16.mxu0 %v403_v60  ;;  %v2242_v58 = vld [vmem:[%s2853_s3 + $0x290] sm:$0xff]   ;;  %v2245_v60 = vld [vmem:[%s2853_s3 + $0x2c8] sm:$0xff]  }
  0x28   :  { %2006 = vmatprep.subr.bf16.mxu0 %v2193_v59  ;;  %1985 = vmatpush3.bf16.msra.mxu1 %v2192_v61  ;;  %v2672_v59 = vrot.slane %v404_v53, %v2476_v45  ;;  %v2244_v61 = vld [vmem:[%s2853_s3 + $0x208] sm:$0xff]  }
  0x29   :  { %1986 = vmatprep.subr.bf16.mxu1 %v2195_v62  ;;  %v2247_v62 = vld [vmem:[%s2853_s3 + $0x240] sm:$0xff]   ;;  %v2284_v53 = vld [vmem:[%s2859_s9 + $0x8] sm:$0xff]  }
  0x2b   :  { %2007 = vmatpush3.bf16.msra.mxu0 %v2194_v63  ;;  %v2246_v63 = vld [vmem:[%s2853_s3 + $0x288] sm:$0xff]  }
  0x2c   :  { %2008 = vmatprep.subr.bf16.mxu0 %v2197_v1  ;;  %1987 = vmatpush3.bf16.msra.mxu1 %v2196_v2  ;;  %v420_v1 = vcombine.high %v2672_v59, %v2672_v59  ;;  %v2249_v2 = vld [vmem:[%s2853_s3 + $0x2c0] sm:$0xff]  }
  0x2d   :  { %1988 = vmatprep.subr.bf16.mxu1 %v2199_v3  ;;  %v2248_v3 = vld [vmem:[%s2853_s3 + $0x200] sm:$0xff]  }
  0x2f   :  { %2009 = vmatpush3.bf16.msra.mxu0 %v2198_v4  ;;  %v427_v4 = vrot.slane %v2566_v18, %v2476_v45  ;;  %v2261_v18 = vld [vmem:[%s2853_s3 + $0x3e8] sm:$0xff]  }
  0x30   :  { %2010 = vmatprep.subr.bf16.mxu0 %v2201_v5  ;;  %1989 = vmatpush3.bf16.msra.mxu1 %v2200_v6  ;;  %v2251_v5 = vld [vmem:[%s2853_s3 + $0x378] sm:$0xff]   ;;  %v2250_v6 = vld [vmem:[%s2853_s3 + $0x280] sm:$0xff]  }
  0x31   :  { %1990 = vmatprep.subr.bf16.mxu1 %v2203_v7  ;;  %v448_v7 = vrot.slane %v420_v1, %v2476_v45 }
  0x33   :  { %2011 = vmatpush3.bf16.msra.mxu0 %v2202_v8  ;;  %v2253_v8 = vld [vmem:[%s2853_s3 + $0x3f8] sm:$0xff]  }
  0x34   :  { %2012 = vmatprep.subr.bf16.mxu0 %v2205_v9  ;;  %1991 = vmatpush3.bf16.msra.mxu1 %v2204_v10  ;;  %v2252_v9 = vld [vmem:[%s2853_s3 + $0x338] sm:$0xff]   ;;  %v449_v10 = vcombine.high %v427_v4, %v427_v4 }
  0x35   :  { %1992 = vmatprep.subr.bf16.mxu1 %v2207_v12  ;;  %v2254_v12 = vld [vmem:[%s2853_s3 + $0x3b8] sm:$0xff]  }
  0x37   :  { %2013 = vmatpush3.bf16.msra.mxu0 %v2206_v13  ;;  %v452_v13 = vcombine.high %v448_v7, %v448_v7 }
  0x38   :  { %2014 = vmatprep.subr.bf16.mxu0 %v2209_v14  ;;  %1993 = vmatpush3.bf16.msra.mxu1 %v2208_v15  ;;  %v2257_v14 = vld [vmem:[%s2853_s3 + $0x3f0] sm:$0xff]  }
  0x39   :  { %1994 = vmatprep.subr.bf16.mxu1 %v2211_v16  ;;  %v2256_v15 = vld [vmem:[%s2853_s3 + $0x330] sm:$0xff]   ;;  %v2259_v16 = vld [vmem:[%s2853_s3 + $0x368] sm:$0xff]  }
  0x3b   :  { %2015 = vmatpush3.bf16.msra.mxu0 %v2210_v17  ;;  %v2258_v17 = vld [vmem:[%s2853_s3 + $0x3b0] sm:$0xff]  }
  0x3c   :  { %2016 = vmatprep.subr.bf16.mxu0 %v2213_v19  ;;  %1995 = vmatpush3.bf16.msra.mxu1 %v2212_v20  ;;  %v2260_v19 = vld [vmem:[%s2853_s3 + $0x328] sm:$0xff]   ;;  %v2263_v20 = vld [vmem:[%s2853_s3 + $0x360] sm:$0xff]  }
  0x3d   :  { %1996 = vmatprep.subr.bf16.mxu1 %v2215_v21  ;;  %v2262_v21 = vld [vmem:[%s2853_s3 + $0x3a8] sm:$0xff]  }
  0x3f   :  { %2017 = vmatpush3.bf16.msra.mxu0 %v2214_v22  ;;  %v2265_v22 = vld [vmem:[%s2853_s3 + $0x3e0] sm:$0xff]  }
  0x40   :  { %2018 = vmatprep.subr.bf16.mxu0 %v2217_v24  ;;  %1997 = vmatpush3.bf16.msra.mxu1 %v2216_v25  ;;  %v2267_v24 = vld [vmem:[%s2853_s3 + $0x358] sm:$0xff]   ;;  %v2266_v25 = vld [vmem:[%s2853_s3 + $0x3a0] sm:$0xff]  }
  0x41   :  { %2026 = vmatprep.subr.bf16.mxu1 %v2219_v27  ;;  %v2268_v27 = vld [vmem:[%s2853_s3 + $0x318] sm:$0xff]  }
  0x43   :  { %2019 = vmatpush3.bf16.msra.mxu0 %v2218_v28  ;;  %1350 = vmatmul.mubr.bf16.vlgmr.msra.gmra.mxu1 %v385_v26  ;;  %v2269_v26 = vld [vmem:[%s2853_s3 + $0x3d8] sm:$0xff]   ;;  %v2271_v28 = vld [vmem:[%s2853_s3 + $0x350] sm:$0xff]  }
  0x44   :  { %2048 = vmatprep.subr.bf16.mxu0 %v2221_v30  ;;  %2027 = vmatpush3.bf16.msra.mxu1 %v2220_v31  ;;  %v2273_v30 = vld [vmem:[%s2853_s3 + $0x3d0] sm:$0xff]  }
  0x45   :  { %1429 = vmatprep.mubr.bf16.mxu1 %v441_v29  ;;  %2028 = vmatprep.subr.bf16.mxu1 %v2223_v34  ;;  %v2270_v29 = vld [vmem:[%s2853_s3 + $0x398] sm:$0xff]   ;;  %v2272_v31 = vld [vmem:[%s2853_s3 + $0x310] sm:$0xff]  }
  0x46   :  { %1390 = vmatmul.mubr.bf16.vlgmr.msra.gmra.mxu0 %v401_v32  ;;  %v2275_v32 = vld [vmem:[%s2853_s3 + $0x348] sm:$0xff]   ;;  %v2274_v34 = vld [vmem:[%s2853_s3 + $0x390] sm:$0xff]  }
  0x47   :  { %2049 = vmatpush3.bf16.msra.mxu0 %v2222_v35  ;;  %1469 = vmatprep.mubr.bf16.mxu0 %v451_v36  ;;  %v2277_v35 = vld [vmem:[%s2853_s3 + $0x3c8] sm:$0xff]  }
  0x48   :  { %2050 = vmatprep.subr.bf16.mxu0 %v2225_v37  ;;  %2029 = vmatpush3.bf16.msra.mxu1 %v2224_v38  ;;  %v2276_v36 = vld [vmem:[%s2853_s3 + $0x308] sm:$0xff]   ;;  %v2279_v37 = vld [vmem:[%s2853_s3 + $0x340] sm:$0xff]  }
  0x49   :  { %2030 = vmatprep.subr.bf16.mxu1 %v2227_v39  ;;  %v2278_v38 = vld [vmem:[%s2853_s3 + $0x388] sm:$0xff]   ;;  %v2281_v39 = vld [vmem:[%s2853_s3 + $0x3c0] sm:$0xff]  }
  0x4b   :  { %2051 = vmatpush3.bf16.msra.mxu0 %v2226_v40  ;;  %v2280_v40 = vld [vmem:[%s2853_s3 + $0x300] sm:$0xff]  }
  0x4c   :  { %2052 = vmatprep.subr.bf16.mxu0 %v2229_v41  ;;  %2031 = vmatpush3.bf16.msra.mxu1 %v2228_v42  ;;  %v434_v41 = vrot.slane %v2672_v59, %v2476_v45  ;;  %v2282_v42 = vld [vmem:[%s2853_s3 + $0x380] sm:$0xff]  }
  0x4d   :  { %2032 = vmatprep.subr.bf16.mxu1 %v2231_v43  ;;  %v1559_v43 = vld [vmem:[%s2856_s5] sm:$0x1] }
  0x4e   :  { %v1557_v45 = vld [vmem:[%s2857_s2] sm:$0x3] }
  0x4f   :  { %2053 = vmatpush3.bf16.msra.mxu0 %v2230_v44  ;;  %v1566_v44 = vsel %vm1564_vm3, %v1559_v43, 0  ;;  %v1927_v43 = vld [vmem:[%s2861_s6] ss:$0 sm:$0xff] }
  0x50   :  { %2054 = vmatprep.subr.bf16.mxu0 %v2233_v46  ;;  %2033 = vmatpush3.bf16.msra.mxu1 %v2232_v47  ;;  %v450_v46 = vcombine.high %v434_v41, %v434_v41  ;;  %v1558_v47 = vpack.c.bf16 %v1557_v45, %v1557_v45 }
  0x51   :  { %2034 = vmatprep.subr.bf16.mxu1 %v2235_v48 }
  0x53   :  { %2055 = vmatpush3.bf16.msra.mxu0 %v2234_v49 }
  0x54   :  { %2056 = vmatprep.subr.bf16.mxu0 %v2237_v50  ;;  %2035 = vmatpush3.bf16.msra.mxu1 %v2236_v51 }
  0x55   :  { %2036 = vmatprep.subr.bf16.mxu1 %v2239_v52  ;;  %v2283_v52 = vld [vmem:[%s2858_s7 + $0x8] sm:$0xff]  }
  0x57   :  { %2057 = vmatpush3.bf16.msra.mxu0 %v2238_v54  ;;  %v2285_v54 = vld [vmem:[%s2858_s7] sm:$0xff]  }
  0x58   :  { %2058 = vmatprep.subr.bf16.mxu0 %v2241_v55  ;;  %2037 = vmatpush3.bf16.msra.mxu1 %v2240_v56  ;;  %v2286_v55 = vld [vmem:[%s2859_s9] sm:$0xff]   ;;  %v19_v56 = vstv %s2860_s8 }
  0x59   :  { %2038 = vmatprep.subr.bf16.mxu1 %v2243_v57  ;;  %20 = vst [vmem:[#allocation2] sm:$0x1] %v19_v56 }
  0x5b   :  { %2059 = vmatpush3.bf16.msra.mxu0 %v2242_v58 }
  0x5c   :  { %2060 = vmatprep.subr.bf16.mxu0 %v2245_v60  ;;  %2039 = vmatpush3.bf16.msra.mxu1 %v2244_v61 }
  0x5d   :  { %2040 = vmatprep.subr.bf16.mxu1 %v2247_v62 }
  0x5f   :  { %2061 = vmatpush3.bf16.msra.mxu0 %v2246_v63 }
  0x60   :  { %2062 = vmatprep.subr.bf16.mxu0 %v2249_v2  ;;  %2041 = vmatpush3.bf16.msra.mxu1 %v2248_v3 }
  0x61   :  { %2070 = vmatprep.subr.bf16.mxu1 %v2251_v5 }
  0x63   :  { %2063 = vmatpush3.bf16.msra.mxu0 %v2250_v6  ;;  %1430 = vmatmul.mubr.bf16.vlgmr.msra.gmra.mxu1 %v427_v4 }
  0x64   :  { %2092 = vmatprep.subr.bf16.mxu0 %v2253_v8  ;;  %2071 = vmatpush3.bf16.msra.mxu1 %v2252_v9 }
  0x65   :  { %1509 = vmatprep.mubr.bf16.mxu1 %v448_v7  ;;  %2072 = vmatprep.subr.bf16.mxu1 %v2255_v11 }
  0x66   :  { %1470 = vmatmul.mubr.bf16.vlgmr.msra.gmra.mxu0 %v449_v10 }
  0x67   :  { %2093 = vmatpush3.bf16.msra.mxu0 %v2254_v12  ;;  %1549 = vmatprep.mubr.bf16.mxu0 %v452_v13 }
  0x68   :  { %2094 = vmatprep.subr.bf16.mxu0 %v2257_v14  ;;  %2073 = vmatpush3.bf16.msra.mxu1 %v2256_v15 }
  0x69   :  { %2074 = vmatprep.subr.bf16.mxu1 %v2259_v16 }
  0x6b   :  { %2095 = vmatpush3.bf16.msra.mxu0 %v2258_v17 }
  0x6c   :  { %2096 = vmatprep.subr.bf16.mxu0 %v2261_v18  ;;  %2075 = vmatpush3.bf16.msra.mxu1 %v2260_v19 }
  0x6d   :  { %2076 = vmatprep.subr.bf16.mxu1 %v2263_v20 }
  0x6f   :  { %2097 = vmatpush3.bf16.msra.mxu0 %v2262_v21 }
  0x70   :  { %2098 = vmatprep.subr.bf16.mxu0 %v2265_v22  ;;  %2077 = vmatpush3.bf16.msra.mxu1 %v2264_v23 }
  0x71   :  { %2078 = vmatprep.subr.bf16.mxu1 %v2267_v24 }
  0x73   :  { %2099 = vmatpush3.bf16.msra.mxu0 %v2266_v25 }
  0x74   :  { %2100 = vmatprep.subr.bf16.mxu0 %v2269_v26  ;;  %2079 = vmatpush3.bf16.msra.mxu1 %v2268_v27 }
  0x75   :  { %2080 = vmatprep.subr.bf16.mxu1 %v2271_v28 }
  0x77   :  { %2101 = vmatpush3.bf16.msra.mxu0 %v2270_v29 }
  0x78   :  { %2102 = vmatprep.subr.bf16.mxu0 %v2273_v30  ;;  %2081 = vmatpush3.bf16.msra.mxu1 %v2272_v31 }
  0x79   :  { %2082 = vmatprep.subr.bf16.mxu1 %v2275_v32 }
  0x7b   :  { %2103 = vmatpush3.bf16.msra.mxu0 %v2274_v34 }
  0x7c   :  { %2104 = vmatprep.subr.bf16.mxu0 %v2277_v35  ;;  %2083 = vmatpush3.bf16.msra.mxu1 %v2276_v36 }
  0x7d   :  { %2084 = vmatprep.subr.bf16.mxu1 %v2279_v37 }
  0x7f   :  { %2105 = vmatpush3.bf16.msra.mxu0 %v2278_v38 }
  0x80   :  { %2106 = vmatprep.subr.bf16.mxu0 %v2281_v39  ;;  %2085 = vmatpush3.bf16.msra.mxu1 %v2280_v40 }
  0x81   :  { %2128 = vmatprep.subr.bf16.mxu1 %v2291_v0 }
  0x83   :  { %2107 = vmatpush3.bf16.msra.mxu0 %v2282_v42  ;;  %1510 = vmatmul.mubr.bf16.vlgmr.msra.gmra.mxu1 %v434_v41 }
  0x84   :  { %2134 = vmatprep.subr.bf16.mxu0 %v2291_v0  ;;  %2129 = vmatpush3.bf16.msra.mxu1 %v1566_v44 }
  0x85   :  { %2130 = vmatprep.mubr.msk.bf16.mxu1 %vm2292_vm1, %v2291_v0  ;;  %2142 = vmatprep.subr.bf16.mxu1 %v2291_v0 }
  0x86   :  { %1550 = vmatmul.mubr.bf16.vlgmr.msra.gmra.mxu0 %v450_v46 }
  0x87   :  { %2138 = vmatprep.mubr.msk.bf16.mxu0 %vm2292_vm1, %v2291_v0  ;;  %2135 = vmatpush3.bf16.msra.mxu0 %v2283_v52  ;;  %v1932_v52 = vld [vmem:[%s2862_s10] ss:$0 sm:$0xff] }
  0x88   :  { %2136 = vmatprep.subr.bf16.mxu0 %v2291_v0 }
  0x8b   :  { %2131 = vmatmul.mubr.msk.bf16.vlgmr.msra.gmra.mxu1 %vm1560_vm4, %v1558_v47  ;;  %2137 = vmatpush3.bf16.msra.mxu0 %v2285_v54 }
  0x8c   :  { %2146 = vmatprep.mubr.msk.bf16.mxu1 %vm2292_vm1, %v2291_v0  ;;  %2143 = vmatpush3.bf16.msra.mxu1 %v2284_v53 }
  0x8d   :  { %2144 = vmatprep.subr.bf16.mxu1 %v2291_v0 }
  0x90   :  { %2145 = vmatpush3.bf16.msra.mxu1 %v2286_v55 }
  0xc6   :  { %v347_v48 = vpop.f32.mrf.mxu0 }
  0xc8   :  { %v2126_v49 = vpop.f32.mrf.mxu0 }
  0xca   :  { %v350_v50 = vpop.f32.mrf.mxu0 }
  0xcc   :  { %v2127_v51 = vpop.f32.mrf.mxu0 }
  0xcd   :  { %v1928_v51 = vld [vmem:[#allocation2] ss:$0 sm:$0xff] }
  0xe2   :  { %v1954_v57 = vpop.f32.mrf.mxu1 }
  0xe4   :  { %v1955_v58 = vpop.f32.mrf.mxu1 }
  0xe5   :  { %v1956_v60 = vadd.f32 %v1955_v58, %v1954_v57 }
  0xe6   :  { %v1976_v59 = vpop.f32.mrf.mxu0  ;;  %v1957_v61 = vpop.f32.mrf.mxu1 }
  0xe7   :  { %v1272_v63 = vadd.f32 %v1956_v60, %v347_v48 }
  0xe8   :  { %v1977_v62 = vpop.f32.mrf.mxu0  ;;  %v1958_v2 = vpop.f32.mrf.mxu1 }
  0xe9   :  { %v1978_v1 = vadd.f32 %v1977_v62, %v1976_v59 }
  0xea   :  { %v1979_v3 = vpop.f32.mrf.mxu0 }
  0xeb   :  { %v1312_v4 = vadd.f32 %v1978_v1, %v1272_v63  ;;  %v1766_v1 = vand.u32 127, %v359_v33 }
  0xec   :  { %v1980_v5 = vpop.f32.mrf.mxu0 }
 0x103   :  { %v1998_v0 = vpop.f32.mrf.mxu1 }
 0x105   :  { %v1999_v6 = vpop.f32.mrf.mxu1 }
 0x106   :  { %v2020_v7 = vpop.f32.mrf.mxu0  ;;  %v2000_v21 = vadd.f32 %v1999_v6, %v1998_v0 }
 0x107   :  { %v2001_v8 = vpop.f32.mrf.mxu1 }
 0x108   :  { %v2021_v9 = vpop.f32.mrf.mxu0  ;;  %v1352_v22 = vadd.f32 %v2000_v21, %v1312_v4 }
 0x109   :  { %v2002_v10 = vpop.f32.mrf.mxu1  ;;  %v2022_v23 = vadd.f32 %v2021_v9, %v2020_v7 }
 0x10a   :  { %v2023_v11 = vpop.f32.mrf.mxu0 }
 0x10b   :  { %v1392_v25 = vadd.f32 %v2022_v23, %v1352_v22 }
 0x10c   :  { %v2024_v12 = vpop.f32.mrf.mxu0 }
 0x123   :  { %v2042_v13 = vpop.f32.mrf.mxu1 }
 0x125   :  { %v2043_v14 = vpop.f32.mrf.mxu1 }
 0x126   :  { %v2064_v15 = vpop.f32.mrf.mxu0  ;;  %v2044_v24 = vadd.f32 %v2043_v14, %v2042_v13 }
 0x127   :  { %v2045_v16 = vpop.f32.mrf.mxu1 }
 0x128   :  { %v2065_v17 = vpop.f32.mrf.mxu0  ;;  %v1432_v26 = vadd.f32 %v2044_v24, %v1392_v25 }
 0x129   :  { %v2046_v18 = vpop.f32.mrf.mxu1  ;;  %v2066_v27 = vadd.f32 %v2065_v17, %v2064_v15 }
 0x12a   :  { %v2067_v19 = vpop.f32.mrf.mxu0 }
 0x12b   :  { %v1472_v31 = vadd.f32 %v2066_v27, %v1432_v26 }
 0x12c   :  { %v2068_v20 = vpop.f32.mrf.mxu0 }
 0x143   :  { %v2086_v28 = vpop.f32.mrf.mxu1 }
 0x145   :  { %v2087_v29 = vpop.f32.mrf.mxu1 }
 0x146   :  { %v2108_v30 = vpop.f32.mrf.mxu0  ;;  %v2088_v32 = vadd.f32 %v2087_v29, %v2086_v28 }
 0x147   :  { %v2089_v34 = vpop.f32.mrf.mxu1 }
 0x148   :  { %v2109_v35 = vpop.f32.mrf.mxu0  ;;  %v1512_v36 = vadd.f32 %v2088_v32, %v1472_v31 }
 0x149   :  { %v2110_v37 = vadd.f32 %v2109_v35, %v2108_v30  ;;  %v2090_v38 = vpop.f32.mrf.mxu1 }
 0x14a   :  { %v2111_v39 = vpop.f32.mrf.mxu0 }
 0x14b   :  { %v1552_v40 = vadd.f32 %v2110_v37, %v1512_v36  ;;  %v1602_v42 = vpop.f32.mrf.mxu1 }
 0x14c   :  { %v2112_v41 = vpop.f32.mrf.mxu0 }
 0x14d   :  { %v1608_v44 = vadd.f32 %v1602_v42, %v1552_v40  ;;  %v2132_v46 = vpop.f32.mrf.mxu1 }
 0x14f   :  { %v1616_v45 = vadd.f32 %v1927_v43, %v1608_v44  ;;  %v1605_v47 = vpop.f32.mrf.mxu1 }
 0x151   :  { %v1617_v48 = vmax.f32 %v1616_v45, 0.0  ;;  %v2133_v49 = vpop.f32.mrf.mxu1 }
 0x153   :  { %v1618_v50 = vpack.c.bf16 %v1617_v48, %v1617_v48 }
 0x155   :  { %2139 = vmatmul.mubr.msk.bf16.vlgmr.msra.gmra.mxu0 %vm1642_vm5, %v1618_v50  ;;  %2147 = vmatmul.mubr.msk.bf16.vlgmr.msra.gmra.mxu1 %vm1642_vm5, %v1618_v50 }
 0x215   :  { %v1680_v53 = vpop.f32.mrf.mxu0  ;;  %v1745_v54 = vpop.f32.mrf.mxu1 }
 0x216   :  { %v1681_v55 = vadd.f32 %v1928_v51, %v1680_v53  ;;  %v1746_v56 = vadd.f32 %v1932_v52, %v1745_v54 }
 0x217   :  { %v2140_v57 = vpop.f32.mrf.mxu0  ;;  %v2148_v58 = vpop.f32.mrf.mxu1 }
 0x218   :  { %1687 = vst.msk [vmem:[%s2863_s11] sm:$0x3] %vm1686_vm6, %v1681_v55  ;;  %v1752_v59 = vsel %vm1751_vm7, %v1746_v56, -inf }
 0x219   :  { %1753 = vmax.xlane.f32.xlu0 %v1752_v59  ;;  %v1683_v60 = vpop.f32.mrf.mxu0  ;;  %v1748_v61 = vpop.f32.mrf.mxu1 }
 0x21b   :  { %v2141_v62 = vpop.f32.mrf.mxu0  ;;  %v2149_v63 = vpop.f32.mrf.mxu1 }
 0x2a2   :  { %v1754_v2 = vpop.xlane.xlu0 %1753 }
 0x2a3   :  { %v1755_v3 = vsub.f32 %v1746_v56, %v1754_v2  ;;  %vm1767_vm8 = vcmp.eq.f32.partialorder %v1746_v56, %v1754_v2 }
 0x2a4   :  { %v1768_v4 = vsel %vm1767_vm8, %v1766_v1, 128 }
 0x2a5   :  { %v1756_v5 = vmul.f32 1.442695, %v1755_v3  ;;  %v1769_v0 = vsel %vm1751_vm7, %v1768_v4, 2147483647 }
 0x2a6   :  { %v1771_v6 = vshra.s32 %v1769_v0, 16  ;;  %v1770_v10 = vand.u32 65535, %v1769_v0 }
 0x2a7   :  { %2287 = vpow2.f32 %v1756_v5 }
 0x2a8   :  { %v1773_v7 = vcvt.s32.f32 %v1771_v6  ;;  %v1772_v12 = vcvt.s32.f32 %v1770_v10 }
 0x2aa   :  { %1774 = vmin.xlane.f32.xlu0 %v1773_v7 }
 0x2b4   :  { %v2288_v8 = vpop.eup %2287 }
 0x2b5   :  { %v1758_v9 = vsel %vm1751_vm7, %v2288_v8, 0.0 }
 0x2b6   :  { %1759 = vadd.xlane.f32.xlu1 %v1758_v9 }
 0x333   :  { %v1775_v11 = vpop.xlane.xlu0 %1774 }
 0x334   :  { %vm1776_vm9 = vcmp.eq.f32.partialorder %v1773_v7, %v1775_v11  ;;  %v1781_v17 = vcvt.f32.s32 %v1775_v11 }
 0x335   :  { %v1777_v33 = vsel %vm1776_vm9, %v1772_v12, inf }
 0x336   :  { %1778 = vmin.xlane.f32.xlu1 %v1777_v33  ;;  %v1782_v19 = vshll.u32 %v1781_v17, 16 }
 0x33f   :  { %v1760_v13 = vpop.xlane.xlu1 %1759 }
 0x340   :  { %2289 = vlog2.f32 %v1760_v13 }
 0x34d   :  { %v2290_v14 = vpop.eup %2289 }
 0x34e   :  { %v1762_v15 = vmul.f32 0.6931472, %v2290_v14 }
 0x350   :  { %v1763_v16 = vsub.f32 0.0, %v1762_v15 }
 0x352   :  { %1764 = vst.msk [vmem:[%s2864_s13] sm:$0x3] %vm1686_vm6, %v1763_v16 }
 0x3bf   :  { %v1779_v18 = vpop.xlane.xlu1 %1778 }
 0x3c0   :  { %v1780_v20 = vcvt.f32.s32 %v1779_v18 }
 0x3c2   :  { %v1783_v21 = vadd.s32 %v1782_v19, %v1780_v20 }
 0x3c4   :  { %1784 = vst.msk [vmem:[%s2865_s12] sm:$0x3] %vm1686_vm6, %v1783_v21 }

</bundles_post_ra>
